<compile_context>
chip_gen: v7x
topology: tpu7x:2x2x1
jax: 0.10.0
libtpu: 0.0.40
codegen_flags: <defaults>
</compile_context>

<pallas_src>
import jax
import jax.numpy as jnp
from jax import lax
from jax.experimental import pallas as pl
from jax.experimental.pallas import tpu as pltpu

_LANE = 128
_MAX_BLOCK_ROWS = 4096            # 4096 x 128 f32 = 2 MiB per input per step
_NPART = 2                        # leading "parallel" grid axis (2 TCs on v7x)
_VMEM_LIMIT = 32 * 1024 * 1024    # covers 3 inputs x 2 bufs x 2 MiB everywhere


def _loss_stats(pred, target, weights):
    """Returns (sum(scale over w>0), count(w>0), count(scale != 0)) as f32
    scalars, where scale = weights * (pred - target)**2 over all elements."""
    n = pred.size
    n_main = (n // _LANE) * _LANE
    rem = n - n_main

    msum = jnp.float32(0.0)
    pcnt = jnp.float32(0.0)
    nzc = jnp.float32(0.0)

    if n_main:
        def slab(x):
            flat = jnp.ravel(x)
            if rem:
                flat = flat[:n_main]
            return flat.reshape(-1, _LANE)      # free bitcast when rem == 0

        p2, t2, w2 = slab(pred), slab(target), slab(weights)
        rows = n_main // _LANE

        # Pick a row tile that is a multiple of 8 whenever possible so the
        # per-step contribution folds to (8, 128) with pure VALU adds.
        if rows % 8 == 0:
            block_rows = min(_MAX_BLOCK_ROWS, rows)
        elif rows > _MAX_BLOCK_ROWS:
            block_rows = _MAX_BLOCK_ROWS        # ragged (masked) last block
        else:
            block_rows = rows                   # full-dim block: always legal
        acc_rows = 8 if block_rows % 8 == 0 else block_rows

        nblk = -(-rows // block_rows)           # ceil: total row blocks
        bpp = -(-nblk // _NPART)                # row blocks per partition

        def rsum(x):
            # (block_rows, 128) -> (acc_rows, 128); sublane-aligned VALU adds,
            # no cross-lane (XLU) work.
            if block_rows % 8 == 0:
                return x.reshape(block_rows // 8, 8, _LANE).sum(axis=0)
            return x                            # small non-multiple-of-8 case

        def kernel(p_ref, t_ref, w_ref, m_ref, cnt_ref, z_ref):
            c = pl.program_id(0)                # partition
            i = pl.program_id(1)                # row-block within partition

            @pl.when(i == 0)
            def _init():
                m_ref[...] = jnp.zeros_like(m_ref)
                cnt_ref[...] = jnp.zeros_like(cnt_ref)
                z_ref[...] = jnp.zeros_like(z_ref)

            p = p_ref[...].astype(jnp.float32)
            t = t_ref[...].astype(jnp.float32)
            w = w_ref[...].astype(jnp.float32)

            start_row = (c * bpp + i) * block_rows
            needs_mask = start_row + block_rows > rows

            @pl.when(jnp.logical_not(needs_mask))
            def _interior():                    # fast path: no masking at all
                scale = w * (p - t) ** 2
                pos = w > 0.0
                m_ref[...] += rsum(jnp.where(pos, scale, 0.0))
                cnt_ref[...] += rsum(jnp.where(pos, 1.0, 0.0))
                z_ref[...] += rsum(jnp.where(scale != 0.0, 1.0, 0.0))

            @pl.when(needs_mask)
            def _tail():
                # Ragged last block and/or the clamped duplicate block of the
                # second partition: rows logically past `rows` contribute 0.
                row_ids = lax.broadcasted_iota(
                    jnp.int32, (block_rows, _LANE), 0)
                valid = (row_ids + start_row) < rows
                wv = jnp.where(valid, w, 0.0)
                scale = wv * (p - t) ** 2       # garbage rows masked below
                pos = wv > 0.0
                m_ref[...] += rsum(jnp.where(pos, scale, 0.0))
                cnt_ref[...] += rsum(jnp.where(pos, 1.0, 0.0))
                z_ref[...] += rsum(
                    jnp.where(jnp.logical_and(valid, scale != 0.0), 1.0, 0.0))

        def in_map(c, i):
            # Clamp so the (possibly empty) tail of a partition re-reads a
            # valid block; its contribution is zeroed by the row mask above.
            return (jnp.minimum(c * bpp + i, nblk - 1), 0)

        in_spec = pl.BlockSpec((block_rows, _LANE), in_map)
        out_spec = pl.BlockSpec((None, acc_rows, _LANE),
                                lambda c, i: (c, 0, 0))
        acc_shape = jax.ShapeDtypeStruct((_NPART, acc_rows, _LANE),
                                         jnp.float32)

        itemsize = jnp.dtype(pred.dtype).itemsize
        cost = pl.CostEstimate(
            flops=10 * n_main,
            transcendentals=0,
            bytes_accessed=3 * n_main * itemsize
                           + 3 * _NPART * acc_rows * _LANE * 4)

        m_acc, p_acc, z_acc = pl.pallas_call(
            kernel,
            out_shape=(acc_shape, acc_shape, acc_shape),
            grid_spec=pltpu.PrefetchScalarGridSpec(
                num_scalar_prefetch=0,
                grid=(_NPART, bpp),
                in_specs=[in_spec, in_spec, in_spec],
                out_specs=(out_spec, out_spec, out_spec),
            ),
            compiler_params=pltpu.CompilerParams(
                dimension_semantics=("parallel", "arbitrary"),
                vmem_limit_bytes=_VMEM_LIMIT),
            cost_estimate=cost,
        )(p2, t2, w2)

        msum += jnp.sum(m_acc)
        pcnt += jnp.sum(p_acc)
        nzc += jnp.sum(z_acc)

    if rem:
        # TODO(synk): the <128-element ragged tail is reduced with plain JAX
        # (negligible work) instead of zero-padding all three inputs in HBM.
        tp = jnp.ravel(pred)[n_main:].astype(jnp.float32)
        tt = jnp.ravel(target)[n_main:].astype(jnp.float32)
        tw = jnp.ravel(weights)[n_main:].astype(jnp.float32)
        tscale = tw * (tp - tt) ** 2
        tpos = tw > 0.0
        msum += jnp.sum(jnp.where(tpos, tscale, 0.0))
        pcnt += jnp.sum(tpos.astype(jnp.float32))
        nzc += jnp.sum((tscale != 0.0).astype(jnp.float32))

    return msum, pcnt, nzc


def _calc_loss(pred, target, weights):
    msum, pcnt, nzc = _loss_stats(pred, target, weights)
    masked_mean = msum / pcnt      # 0/0 -> NaN, matching torch.mean(empty)
    # If no scale element is nonzero, torch.mean(scale) is identically 0.
    return jnp.where(nzc > 0.0, masked_mean, jnp.float32(0.0))


def weighted_mse_loss_double(affs_prediction, affs_target, affs_weights,
                             lsds_prediction, lsds_target, lsds_weights):
    loss = _calc_loss(affs_prediction, affs_target, affs_weights)
    loss = loss + _calc_loss(lsds_prediction, lsds_target, lsds_weights)
    return loss


def _reference_loss(ap, at, aw, lp, lt, lw):
    """Pure-JAX reference reproducing the PyTorch semantics."""
    def calc(p, t, w):
        scale = w * (p - t) ** 2
        any_nz = jnp.any(scale != 0)
        pos = w > 0
        masked_mean = jnp.sum(jnp.where(pos, scale, 0.0)) / jnp.sum(pos)
        return jnp.where(any_nz, masked_mean, jnp.mean(scale))
    return calc(ap, at, aw) + calc(lp, lt, lw)


if __name__ == "__main__":
    key = jax.random.PRNGKey(0)
    k = jax.random.split(key, 6)

    # affs: (batch=2, channels=3, 16, 16); lsds: (batch=2, channels=10, 16, 16)
    affs_pred = jax.random.normal(k[0], (2, 3, 16, 16), jnp.float32)
    affs_tgt = jax.random.normal(k[1], (2, 3, 16, 16), jnp.float32)
    aw_raw = jax.random.uniform(k[2], (2, 3, 16, 16), jnp.float32)
    affs_w = jnp.where(aw_raw > 0.5, aw_raw, 0.0)   # mix of zero / positive

    lsds_pred = jax.random.normal(k[3], (2, 10, 16, 16), jnp.float32)
    lsds_tgt = jax.random.normal(k[4], (2, 10, 16, 16), jnp.float32)
    lw_raw = jax.random.uniform(k[5], (2, 10, 16, 16), jnp.float32)
    lsds_w = jnp.where(lw_raw > 0.3, lw_raw, 0.0)

    loss = jax.jit(weighted_mse_loss_double)(
        affs_pred, affs_tgt, affs_w, lsds_pred, lsds_tgt, lsds_w)
    loss = jax.block_until_ready(loss)

    ref = _reference_loss(affs_pred, affs_tgt, affs_w,
                          lsds_pred, lsds_tgt, lsds_w)
    assert jnp.allclose(loss, ref, rtol=1e-5, atol=1e-6), (loss, ref)

    print("KERNEL_OK")
</pallas_src>

<mosaic_0001>
module attributes {stable_mosaic.version = 11 : i64} {
  func.func @kernel(%arg0: i32, %arg1: i32, %arg2: memref<40x128xf32, #tpu.memory_space<vmem>>, %arg3: memref<40x128xf32, #tpu.memory_space<vmem>>, %arg4: memref<40x128xf32, #tpu.memory_space<vmem>>, %arg5: memref<1x8x128xf32, #tpu.memory_space<vmem>>, %arg6: memref<1x8x128xf32, #tpu.memory_space<vmem>>, %arg7: memref<1x8x128xf32, #tpu.memory_space<vmem>>) attributes {dimension_semantics = [#tpu.dimension_semantics<parallel>, #tpu.dimension_semantics<arbitrary>], iteration_bounds = array<i64: 2, 1>, scalar_prefetch = 0 : i64, scratch_operands = 0 : i64, tpu.core_type = #tpu.core_type<tc>, window_params = [{transform_indices = @transform_0, window_bounds = array<i64: 40, 128>}, {transform_indices = @transform_1, window_bounds = array<i64: 40, 128>}, {transform_indices = @transform_2, window_bounds = array<i64: 40, 128>}, {transform_indices = @transform_3, window_bounds = array<i64: 1, 8, 128>}, {transform_indices = @transform_4, window_bounds = array<i64: 1, 8, 128>}, {transform_indices = @transform_5, window_bounds = array<i64: 1, 8, 128>}]} {
    %c0_i32 = arith.constant 0 : i32
    %0 = arith.cmpi eq, %arg1, %c0_i32 : i32
    %1 = arith.extui %0 : i1 to i32
    %c0_i32_0 = arith.constant 0 : i32
    %2 = arith.cmpi ne, %1, %c0_i32_0 : i32
    scf.if %2 {
      %cst = arith.constant 0.000000e+00 : f32
      %16 = vector.broadcast %cst : f32 to vector<8x128xf32>
      %c0_10 = arith.constant 0 : index
      %c0_11 = arith.constant 0 : index
      %c0_12 = arith.constant 0 : index
      %17 = vector.load %arg5[%c0_10, %c0_11, %c0_12] : memref<1x8x128xf32, #tpu.memory_space<vmem>>, vector<1x8x128xf32>
      %18 = vector.shape_cast %17 : vector<1x8x128xf32> to vector<8x128xf32>
      %19 = vector.shape_cast %16 : vector<8x128xf32> to vector<1x8x128xf32>
      tpu.vector_store %arg5[%c0_10, %c0_11, %c0_12], %19 {strides = array<i32>} : memref<1x8x128xf32, #tpu.memory_space<vmem>>, vector<1x8x128xf32>,
      %cst_13 = arith.constant 0.000000e+00 : f32
      %20 = vector.broadcast %cst_13 : f32 to vector<8x128xf32>
      %c0_14 = arith.constant 0 : index
      %c0_15 = arith.constant 0 : index
      %c0_16 = arith.constant 0 : index
      %21 = vector.load %arg6[%c0_14, %c0_15, %c0_16] : memref<1x8x128xf32, #tpu.memory_space<vmem>>, vector<1x8x128xf32>
      %22 = vector.shape_cast %21 : vector<1x8x128xf32> to vector<8x128xf32>
      %23 = vector.shape_cast %20 : vector<8x128xf32> to vector<1x8x128xf32>
      tpu.vector_store %arg6[%c0_14, %c0_15, %c0_16], %23 {strides = array<i32>} : memref<1x8x128xf32, #tpu.memory_space<vmem>>, vector<1x8x128xf32>,
      %cst_17 = arith.constant 0.000000e+00 : f32
      %24 = vector.broadcast %cst_17 : f32 to vector<8x128xf32>
      %c0_18 = arith.constant 0 : index
      %c0_19 = arith.constant 0 : index
      %c0_20 = arith.constant 0 : index
      %25 = vector.load %arg7[%c0_18, %c0_19, %c0_20] : memref<1x8x128xf32, #tpu.memory_space<vmem>>, vector<1x8x128xf32>
      %26 = vector.shape_cast %25 : vector<1x8x128xf32> to vector<8x128xf32>
      %27 = vector.shape_cast %24 : vector<8x128xf32> to vector<1x8x128xf32>
      tpu.vector_store %arg7[%c0_18, %c0_19, %c0_20], %27 {strides = array<i32>} : memref<1x8x128xf32, #tpu.memory_space<vmem>>, vector<1x8x128xf32>,
    } else {
    }
    %c0 = arith.constant 0 : index
    %c0_1 = arith.constant 0 : index
    %3 = vector.load %arg2[%c0, %c0_1] : memref<40x128xf32, #tpu.memory_space<vmem>>, vector<40x128xf32>
    %c0_2 = arith.constant 0 : index
    %c0_3 = arith.constant 0 : index
    %4 = vector.load %arg3[%c0_2, %c0_3] : memref<40x128xf32, #tpu.memory_space<vmem>>, vector<40x128xf32>
    %c0_4 = arith.constant 0 : index
    %c0_5 = arith.constant 0 : index
    %5 = vector.load %arg4[%c0_4, %c0_5] : memref<40x128xf32, #tpu.memory_space<vmem>>, vector<40x128xf32>
    %c1_i32 = arith.constant 1 : i32
    %6 = arith.muli %arg0, %c1_i32 : i32
    %7 = arith.addi %6, %arg1 : i32
    %c40_i32 = arith.constant 40 : i32
    %8 = arith.muli %7, %c40_i32 : i32
    %c40_i32_6 = arith.constant 40 : i32
    %9 = arith.addi %8, %c40_i32_6 : i32
    %c40_i32_7 = arith.constant 40 : i32
    %10 = arith.cmpi sgt, %9, %c40_i32_7 : i32
    %true = arith.constant true
    %11 = arith.xori %10, %true : i1
    %12 = arith.extui %11 : i1 to i32
    %c0_i32_8 = arith.constant 0 : i32
    %13 = arith.cmpi ne, %12, %c0_i32_8 : i32
    scf.if %13 {
      %16 = arith.subf %3, %4 : vector<40x128xf32>
      %17 = arith.mulf %16, %16 : vector<40x128xf32>
      %18 = arith.mulf %5, %17 : vector<40x128xf32>
      %cst = arith.constant 0.000000e+00 : f32
      %19 = vector.broadcast %cst : f32 to vector<40x128xf32>
      %20 = arith.cmpf ogt, %5, %19 : vector<40x128xf32>
      %c0_10 = arith.constant 0 : index
      %c0_11 = arith.constant 0 : index
      %c0_12 = arith.constant 0 : index
      %21 = vector.load %arg5[%c0_10, %c0_11, %c0_12] : memref<1x8x128xf32, #tpu.memory_space<vmem>>, vector<1x8x128xf32>
      %22 = vector.shape_cast %21 : vector<1x8x128xf32> to vector<8x128xf32>
      %cst_13 = arith.constant 0.000000e+00 : f32
      %23 = vector.broadcast %cst_13 : f32 to vector<40x128xf32>
      %24 = arith.select %20, %18, %23 : vector<40x128xi1>, vector<40x128xf32>
      %25 = vector.shape_cast %24 : vector<40x128xf32> to vector<5x8x128xf32>
      %cst_14 = arith.constant dense<0.000000e+00> : vector<8x128xf32>
      %26 = vector.multi_reduction <add>, %25, %cst_14 [0] : vector<5x8x128xf32> to vector<8x128xf32>
      %27 = arith.addf %22, %26 : vector<8x128xf32>
      %c0_15 = arith.constant 0 : index
      %c0_16 = arith.constant 0 : index
      %c0_17 = arith.constant 0 : index
      %28 = vector.load %arg5[%c0_15, %c0_16, %c0_17] : memref<1x8x128xf32, #tpu.memory_space<vmem>>, vector<1x8x128xf32>
      %29 = vector.shape_cast %28 : vector<1x8x128xf32> to vector<8x128xf32>
      %30 = vector.shape_cast %27 : vector<8x128xf32> to vector<1x8x128xf32>
      tpu.vector_store %arg5[%c0_15, %c0_16, %c0_17], %30 {strides = array<i32>} : memref<1x8x128xf32, #tpu.memory_space<vmem>>, vector<1x8x128xf32>,
      %c0_18 = arith.constant 0 : index
      %c0_19 = arith.constant 0 : index
      %c0_20 = arith.constant 0 : index
      %31 = vector.load %arg6[%c0_18, %c0_19, %c0_20] : memref<1x8x128xf32, #tpu.memory_space<vmem>>, vector<1x8x128xf32>
      %32 = vector.shape_cast %31 : vector<1x8x128xf32> to vector<8x128xf32>
      %cst_21 = arith.constant 1.000000e+00 : f32
      %cst_22 = arith.constant 0.000000e+00 : f32
      %33 = vector.broadcast %cst_21 : f32 to vector<40x128xf32>
      %34 = vector.broadcast %cst_22 : f32 to vector<40x128xf32>
      %35 = arith.select %20, %33, %34 : vector<40x128xi1>, vector<40x128xf32>
      %36 = vector.shape_cast %35 : vector<40x128xf32> to vector<5x8x128xf32>
      %cst_23 = arith.constant dense<0.000000e+00> : vector<8x128xf32>
      %37 = vector.multi_reduction <add>, %36, %cst_23 [0] : vector<5x8x128xf32> to vector<8x128xf32>
      %38 = arith.addf %32, %37 : vector<8x128xf32>
      %c0_24 = arith.constant 0 : index
      %c0_25 = arith.constant 0 : index
      %c0_26 = arith.constant 0 : index
      %39 = vector.load %arg6[%c0_24, %c0_25, %c0_26] : memref<1x8x128xf32, #tpu.memory_space<vmem>>, vector<1x8x128xf32>
      %40 = vector.shape_cast %39 : vector<1x8x128xf32> to vector<8x128xf32>
      %41 = vector.shape_cast %38 : vector<8x128xf32> to vector<1x8x128xf32>
      tpu.vector_store %arg6[%c0_24, %c0_25, %c0_26], %41 {strides = array<i32>} : memref<1x8x128xf32, #tpu.memory_space<vmem>>, vector<1x8x128xf32>,
      %c0_27 = arith.constant 0 : index
      %c0_28 = arith.constant 0 : index
      %c0_29 = arith.constant 0 : index
      %42 = vector.load %arg7[%c0_27, %c0_28, %c0_29] : memref<1x8x128xf32, #tpu.memory_space<vmem>>, vector<1x8x128xf32>
      %43 = vector.shape_cast %42 : vector<1x8x128xf32> to vector<8x128xf32>
      %cst_30 = arith.constant 0.000000e+00 : f32
      %44 = vector.broadcast %cst_30 : f32 to vector<40x128xf32>
      %45 = arith.cmpf one, %18, %44 : vector<40x128xf32>
      %cst_31 = arith.constant 1.000000e+00 : f32
      %cst_32 = arith.constant 0.000000e+00 : f32
      %46 = vector.broadcast %cst_31 : f32 to vector<40x128xf32>
      %47 = vector.broadcast %cst_32 : f32 to vector<40x128xf32>
      %48 = arith.select %45, %46, %47 : vector<40x128xi1>, vector<40x128xf32>
      %49 = vector.shape_cast %48 : vector<40x128xf32> to vector<5x8x128xf32>
      %cst_33 = arith.constant dense<0.000000e+00> : vector<8x128xf32>
      %50 = vector.multi_reduction <add>, %49, %cst_33 [0] : vector<5x8x128xf32> to vector<8x128xf32>
      %51 = arith.addf %43, %50 : vector<8x128xf32>
      %c0_34 = arith.constant 0 : index
      %c0_35 = arith.constant 0 : index
      %c0_36 = arith.constant 0 : index
      %52 = vector.load %arg7[%c0_34, %c0_35, %c0_36] : memref<1x8x128xf32, #tpu.memory_space<vmem>>, vector<1x8x128xf32>
      %53 = vector.shape_cast %52 : vector<1x8x128xf32> to vector<8x128xf32>
      %54 = vector.shape_cast %51 : vector<8x128xf32> to vector<1x8x128xf32>
      tpu.vector_store %arg7[%c0_34, %c0_35, %c0_36], %54 {strides = array<i32>} : memref<1x8x128xf32, #tpu.memory_space<vmem>>, vector<1x8x128xf32>,
    } else {
    }
    %14 = arith.extui %10 : i1 to i32
    %c0_i32_9 = arith.constant 0 : i32
    %15 = arith.cmpi ne, %14, %c0_i32_9 : i32
    scf.if %15 {
      %16 = tpu.iota {dimensions = array<i32: 0>} : vector<40x128xi32>
      %17 = vector.broadcast %8 : i32 to vector<40x128xi32>
      %18 = arith.addi %16, %17 : vector<40x128xi32>
      %c40_i32_10 = arith.constant 40 : i32
      %19 = vector.broadcast %c40_i32_10 : i32 to vector<40x128xi32>
      %20 = arith.cmpi slt, %18, %19 : vector<40x128xi32>
      %cst = arith.constant 0.000000e+00 : f32
      %21 = vector.broadcast %cst : f32 to vector<40x128xf32>
      %22 = arith.select %20, %5, %21 : vector<40x128xi1>, vector<40x128xf32>
      %23 = arith.subf %3, %4 : vector<40x128xf32>
      %24 = arith.mulf %23, %23 : vector<40x128xf32>
      %25 = arith.mulf %22, %24 : vector<40x128xf32>
      %cst_11 = arith.constant 0.000000e+00 : f32
      %26 = vector.broadcast %cst_11 : f32 to vector<40x128xf32>
      %27 = arith.cmpf ogt, %22, %26 : vector<40x128xf32>
      %c0_12 = arith.constant 0 : index
      %c0_13 = arith.constant 0 : index
      %c0_14 = arith.constant 0 : index
      %28 = vector.load %arg5[%c0_12, %c0_13, %c0_14] : memref<1x8x128xf32, #tpu.memory_space<vmem>>, vector<1x8x128xf32>
      %29 = vector.shape_cast %28 : vector<1x8x128xf32> to vector<8x128xf32>
      %cst_15 = arith.constant 0.000000e+00 : f32
      %30 = vector.broadcast %cst_15 : f32 to vector<40x128xf32>
      %31 = arith.select %27, %25, %30 : vector<40x128xi1>, vector<40x128xf32>
      %32 = vector.shape_cast %31 : vector<40x128xf32> to vector<5x8x128xf32>
      %cst_16 = arith.constant dense<0.000000e+00> : vector<8x128xf32>
      %33 = vector.multi_reduction <add>, %32, %cst_16 [0] : vector<5x8x128xf32> to vector<8x128xf32>
      %34 = arith.addf %29, %33 : vector<8x128xf32>
      %c0_17 = arith.constant 0 : index
      %c0_18 = arith.constant 0 : index
      %c0_19 = arith.constant 0 : index
      %35 = vector.load %arg5[%c0_17, %c0_18, %c0_19] : memref<1x8x128xf32, #tpu.memory_space<vmem>>, vector<1x8x128xf32>
      %36 = vector.shape_cast %35 : vector<1x8x128xf32> to vector<8x128xf32>
      %37 = vector.shape_cast %34 : vector<8x128xf32> to vector<1x8x128xf32>
      tpu.vector_store %arg5[%c0_17, %c0_18, %c0_19], %37 {strides = array<i32>} : memref<1x8x128xf32, #tpu.memory_space<vmem>>, vector<1x8x128xf32>,
      %c0_20 = arith.constant 0 : index
      %c0_21 = arith.constant 0 : index
      %c0_22 = arith.constant 0 : index
      %38 = vector.load %arg6[%c0_20, %c0_21, %c0_22] : memref<1x8x128xf32, #tpu.memory_space<vmem>>, vector<1x8x128xf32>
      %39 = vector.shape_cast %38 : vector<1x8x128xf32> to vector<8x128xf32>
      %cst_23 = arith.constant 1.000000e+00 : f32
      %cst_24 = arith.constant 0.000000e+00 : f32
      %40 = vector.broadcast %cst_23 : f32 to vector<40x128xf32>
      %41 = vector.broadcast %cst_24 : f32 to vector<40x128xf32>
      %42 = arith.select %27, %40, %41 : vector<40x128xi1>, vector<40x128xf32>
      %43 = vector.shape_cast %42 : vector<40x128xf32> to vector<5x8x128xf32>
      %cst_25 = arith.constant dense<0.000000e+00> : vector<8x128xf32>
      %44 = vector.multi_reduction <add>, %43, %cst_25 [0] : vector<5x8x128xf32> to vector<8x128xf32>
      %45 = arith.addf %39, %44 : vector<8x128xf32>
      %c0_26 = arith.constant 0 : index
      %c0_27 = arith.constant 0 : index
      %c0_28 = arith.constant 0 : index
      %46 = vector.load %arg6[%c0_26, %c0_27, %c0_28] : memref<1x8x128xf32, #tpu.memory_space<vmem>>, vector<1x8x128xf32>
      %47 = vector.shape_cast %46 : vector<1x8x128xf32> to vector<8x128xf32>
      %48 = vector.shape_cast %45 : vector<8x128xf32> to vector<1x8x128xf32>
      tpu.vector_store %arg6[%c0_26, %c0_27, %c0_28], %48 {strides = array<i32>} : memref<1x8x128xf32, #tpu.memory_space<vmem>>, vector<1x8x128xf32>,
      %c0_29 = arith.constant 0 : index
      %c0_30 = arith.constant 0 : index
      %c0_31 = arith.constant 0 : index
      %49 = vector.load %arg7[%c0_29, %c0_30, %c0_31] : memref<1x8x128xf32, #tpu.memory_space<vmem>>, vector<1x8x128xf32>
      %50 = vector.shape_cast %49 : vector<1x8x128xf32> to vector<8x128xf32>
      %cst_32 = arith.constant 0.000000e+00 : f32
      %51 = vector.broadcast %cst_32 : f32 to vector<40x128xf32>
      %52 = arith.cmpf one, %25, %51 : vector<40x128xf32>
      %53 = arith.andi %20, %52 : vector<40x128xi1>
      %cst_33 = arith.constant 1.000000e+00 : f32
      %cst_34 = arith.constant 0.000000e+00 : f32
      %54 = vector.broadcast %cst_33 : f32 to vector<40x128xf32>
      %55 = vector.broadcast %cst_34 : f32 to vector<40x128xf32>
      %56 = arith.select %53, %54, %55 : vector<40x128xi1>, vector<40x128xf32>
      %57 = vector.shape_cast %56 : vector<40x128xf32> to vector<5x8x128xf32>
      %cst_35 = arith.constant dense<0.000000e+00> : vector<8x128xf32>
      %58 = vector.multi_reduction <add>, %57, %cst_35 [0] : vector<5x8x128xf32> to vector<8x128xf32>
      %59 = arith.addf %50, %58 : vector<8x128xf32>
      %c0_36 = arith.constant 0 : index
      %c0_37 = arith.constant 0 : index
      %c0_38 = arith.constant 0 : index
      %60 = vector.load %arg7[%c0_36, %c0_37, %c0_38] : memref<1x8x128xf32, #tpu.memory_space<vmem>>, vector<1x8x128xf32>
      %61 = vector.shape_cast %60 : vector<1x8x128xf32> to vector<8x128xf32>
      %62 = vector.shape_cast %59 : vector<8x128xf32> to vector<1x8x128xf32>
      tpu.vector_store %arg7[%c0_36, %c0_37, %c0_38], %62 {strides = array<i32>} : memref<1x8x128xf32, #tpu.memory_space<vmem>>, vector<1x8x128xf32>,
    } else {
    }
    return
  }
  func.func @transform_0(%arg0: i32, %arg1: i32) -> (i32, i32) {
    %c1_i32 = arith.constant 1 : i32
    %0 = arith.muli %arg0, %c1_i32 : i32
    %1 = arith.addi %0, %arg1 : i32
    %c0_i32 = arith.constant 0 : i32
    %2 = arith.minsi %1, %c0_i32 : i32
    %c0_i32_0 = arith.constant 0 : i32
    %c0_i32_1 = arith.constant 0 : i32
    return %2, %c0_i32_0 : i32, i32
  }
  func.func @transform_1(%arg0: i32, %arg1: i32) -> (i32, i32) {
    %c1_i32 = arith.constant 1 : i32
    %0 = arith.muli %arg0, %c1_i32 : i32
    %1 = arith.addi %0, %arg1 : i32
    %c0_i32 = arith.constant 0 : i32
    %2 = arith.minsi %1, %c0_i32 : i32
    %c0_i32_0 = arith.constant 0 : i32
    %c0_i32_1 = arith.constant 0 : i32
    return %2, %c0_i32_0 : i32, i32
  }
  func.func @transform_2(%arg0: i32, %arg1: i32) -> (i32, i32) {
    %c1_i32 = arith.constant 1 : i32
    %0 = arith.muli %arg0, %c1_i32 : i32
    %1 = arith.addi %0, %arg1 : i32
    %c0_i32 = arith.constant 0 : i32
    %2 = arith.minsi %1, %c0_i32 : i32
    %c0_i32_0 = arith.constant 0 : i32
    %c0_i32_1 = arith.constant 0 : i32
    return %2, %c0_i32_0 : i32, i32
  }
  func.func @transform_3(%arg0: i32, %arg1: i32) -> (i32, i32, i32) {
    %c0_i32 = arith.constant 0 : i32
    %c0_i32_0 = arith.constant 0 : i32
    %c0_i32_1 = arith.constant 0 : i32
    return %arg0, %c0_i32, %c0_i32_0 : i32, i32, i32
  }
  func.func @transform_4(%arg0: i32, %arg1: i32) -> (i32, i32, i32) {
    %c0_i32 = arith.constant 0 : i32
    %c0_i32_0 = arith.constant 0 : i32
    %c0_i32_1 = arith.constant 0 : i32
    return %arg0, %c0_i32, %c0_i32_0 : i32, i32, i32
  }
  func.func @transform_5(%arg0: i32, %arg1: i32) -> (i32, i32, i32) {
    %c0_i32 = arith.constant 0 : i32
    %c0_i32_0 = arith.constant 0 : i32
    %c0_i32_1 = arith.constant 0 : i32
    return %arg0, %c0_i32, %c0_i32_0 : i32, i32, i32
  }
}

module attributes {stable_mosaic.version = 11 : i64} {
  func.func @kernel(%arg0: i32, %arg1: i32, %arg2: memref<12x128xf32, #tpu.memory_space<vmem>>, %arg3: memref<12x128xf32, #tpu.memory_space<vmem>>, %arg4: memref<12x128xf32, #tpu.memory_space<vmem>>, %arg5: memref<1x12x128xf32, #tpu.memory_space<vmem>>, %arg6: memref<1x12x128xf32, #tpu.memory_space<vmem>>, %arg7: memref<1x12x128xf32, #tpu.memory_space<vmem>>) attributes {dimension_semantics = [#tpu.dimension_semantics<parallel>, #tpu.dimension_semantics<arbitrary>], iteration_bounds = array<i64: 2, 1>, scalar_prefetch = 0 : i64, scratch_operands = 0 : i64, tpu.core_type = #tpu.core_type<tc>, window_params = [{transform_indices = @transform_0, window_bounds = array<i64: 12, 128>}, {transform_indices = @transform_1, window_bounds = array<i64: 12, 128>}, {transform_indices = @transform_2, window_bounds = array<i64: 12, 128>}, {transform_indices = @transform_3, window_bounds = array<i64: 1, 12, 128>}, {transform_indices = @transform_4, window_bounds = array<i64: 1, 12, 128>}, {transform_indices = @transform_5, window_bounds = array<i64: 1, 12, 128>}]} {
    %c0_i32 = arith.constant 0 : i32
    %0 = arith.cmpi eq, %arg1, %c0_i32 : i32
    %1 = arith.extui %0 : i1 to i32
    %c0_i32_0 = arith.constant 0 : i32
    %2 = arith.cmpi ne, %1, %c0_i32_0 : i32
    scf.if %2 {
      %cst = arith.constant 0.000000e+00 : f32
      %16 = vector.broadcast %cst : f32 to vector<12x128xf32>
      %c0_10 = arith.constant 0 : index
      %c0_11 = arith.constant 0 : index
      %c0_12 = arith.constant 0 : index
      %17 = vector.load %arg5[%c0_10, %c0_11, %c0_12] : memref<1x12x128xf32, #tpu.memory_space<vmem>>, vector<1x12x128xf32>
      %18 = vector.shape_cast %17 : vector<1x12x128xf32> to vector<12x128xf32>
      %19 = vector.shape_cast %16 : vector<12x128xf32> to vector<1x12x128xf32>
      tpu.vector_store %arg5[%c0_10, %c0_11, %c0_12], %19 {strides = array<i32>} : memref<1x12x128xf32, #tpu.memory_space<vmem>>, vector<1x12x128xf32>,
      %cst_13 = arith.constant 0.000000e+00 : f32
      %20 = vector.broadcast %cst_13 : f32 to vector<12x128xf32>
      %c0_14 = arith.constant 0 : index
      %c0_15 = arith.constant 0 : index
      %c0_16 = arith.constant 0 : index
      %21 = vector.load %arg6[%c0_14, %c0_15, %c0_16] : memref<1x12x128xf32, #tpu.memory_space<vmem>>, vector<1x12x128xf32>
      %22 = vector.shape_cast %21 : vector<1x12x128xf32> to vector<12x128xf32>
      %23 = vector.shape_cast %20 : vector<12x128xf32> to vector<1x12x128xf32>
      tpu.vector_store %arg6[%c0_14, %c0_15, %c0_16], %23 {strides = array<i32>} : memref<1x12x128xf32, #tpu.memory_space<vmem>>, vector<1x12x128xf32>,
      %cst_17 = arith.constant 0.000000e+00 : f32
      %24 = vector.broadcast %cst_17 : f32 to vector<12x128xf32>
      %c0_18 = arith.constant 0 : index
      %c0_19 = arith.constant 0 : index
      %c0_20 = arith.constant 0 : index
      %25 = vector.load %arg7[%c0_18, %c0_19, %c0_20] : memref<1x12x128xf32, #tpu.memory_space<vmem>>, vector<1x12x128xf32>
      %26 = vector.shape_cast %25 : vector<1x12x128xf32> to vector<12x128xf32>
      %27 = vector.shape_cast %24 : vector<12x128xf32> to vector<1x12x128xf32>
      tpu.vector_store %arg7[%c0_18, %c0_19, %c0_20], %27 {strides = array<i32>} : memref<1x12x128xf32, #tpu.memory_space<vmem>>, vector<1x12x128xf32>,
    } else {
    }
    %c0 = arith.constant 0 : index
    %c0_1 = arith.constant 0 : index
    %3 = vector.load %arg2[%c0, %c0_1] : memref<12x128xf32, #tpu.memory_space<vmem>>, vector<12x128xf32>
    %c0_2 = arith.constant 0 : index
    %c0_3 = arith.constant 0 : index
    %4 = vector.load %arg3[%c0_2, %c0_3] : memref<12x128xf32, #tpu.memory_space<vmem>>, vector<12x128xf32>
    %c0_4 = arith.constant 0 : index
    %c0_5 = arith.constant 0 : index
    %5 = vector.load %arg4[%c0_4, %c0_5] : memref<12x128xf32, #tpu.memory_space<vmem>>, vector<12x128xf32>
    %c1_i32 = arith.constant 1 : i32
    %6 = arith.muli %arg0, %c1_i32 : i32
    %7 = arith.addi %6, %arg1 : i32
    %c12_i32 = arith.constant 12 : i32
    %8 = arith.muli %7, %c12_i32 : i32
    %c12_i32_6 = arith.constant 12 : i32
    %9 = arith.addi %8, %c12_i32_6 : i32
    %c12_i32_7 = arith.constant 12 : i32
    %10 = arith.cmpi sgt, %9, %c12_i32_7 : i32
    %true = arith.constant true
    %11 = arith.xori %10, %true : i1
    %12 = arith.extui %11 : i1 to i32
    %c0_i32_8 = arith.constant 0 : i32
    %13 = arith.cmpi ne, %12, %c0_i32_8 : i32
    scf.if %13 {
      %16 = arith.subf %3, %4 : vector<12x128xf32>
      %17 = arith.mulf %16, %16 : vector<12x128xf32>
      %18 = arith.mulf %5, %17 : vector<12x128xf32>
      %cst = arith.constant 0.000000e+00 : f32
      %19 = vector.broadcast %cst : f32 to vector<12x128xf32>
      %20 = arith.cmpf ogt, %5, %19 : vector<12x128xf32>
      %c0_10 = arith.constant 0 : index
      %c0_11 = arith.constant 0 : index
      %c0_12 = arith.constant 0 : index
      %21 = vector.load %arg5[%c0_10, %c0_11, %c0_12] : memref<1x12x128xf32, #tpu.memory_space<vmem>>, vector<1x12x128xf32>
      %22 = vector.shape_cast %21 : vector<1x12x128xf32> to vector<12x128xf32>
      %cst_13 = arith.constant 0.000000e+00 : f32
      %23 = vector.broadcast %cst_13 : f32 to vector<12x128xf32>
      %24 = arith.select %20, %18, %23 : vector<12x128xi1>, vector<12x128xf32>
      %25 = arith.addf %22, %24 : vector<12x128xf32>
      %c0_14 = arith.constant 0 : index
      %c0_15 = arith.constant 0 : index
      %c0_16 = arith.constant 0 : index
      %26 = vector.load %arg5[%c0_14, %c0_15, %c0_16] : memref<1x12x128xf32, #tpu.memory_space<vmem>>, vector<1x12x128xf32>
      %27 = vector.shape_cast %26 : vector<1x12x128xf32> to vector<12x128xf32>
      %28 = vector.shape_cast %25 : vector<12x128xf32> to vector<1x12x128xf32>
      tpu.vector_store %arg5[%c0_14, %c0_15, %c0_16], %28 {strides = array<i32>} : memref<1x12x128xf32, #tpu.memory_space<vmem>>, vector<1x12x128xf32>,
      %c0_17 = arith.constant 0 : index
      %c0_18 = arith.constant 0 : index
      %c0_19 = arith.constant 0 : index
      %29 = vector.load %arg6[%c0_17, %c0_18, %c0_19] : memref<1x12x128xf32, #tpu.memory_space<vmem>>, vector<1x12x128xf32>
      %30 = vector.shape_cast %29 : vector<1x12x128xf32> to vector<12x128xf32>
      %cst_20 = arith.constant 1.000000e+00 : f32
      %cst_21 = arith.constant 0.000000e+00 : f32
      %31 = vector.broadcast %cst_20 : f32 to vector<12x128xf32>
      %32 = vector.broadcast %cst_21 : f32 to vector<12x128xf32>
      %33 = arith.select %20, %31, %32 : vector<12x128xi1>, vector<12x128xf32>
      %34 = arith.addf %30, %33 : vector<12x128xf32>
      %c0_22 = arith.constant 0 : index
      %c0_23 = arith.constant 0 : index
      %c0_24 = arith.constant 0 : index
      %35 = vector.load %arg6[%c0_22, %c0_23, %c0_24] : memref<1x12x128xf32, #tpu.memory_space<vmem>>, vector<1x12x128xf32>
      %36 = vector.shape_cast %35 : vector<1x12x128xf32> to vector<12x128xf32>
      %37 = vector.shape_cast %34 : vector<12x128xf32> to vector<1x12x128xf32>
      tpu.vector_store %arg6[%c0_22, %c0_23, %c0_24], %37 {strides = array<i32>} : memref<1x12x128xf32, #tpu.memory_space<vmem>>, vector<1x12x128xf32>,
      %c0_25 = arith.constant 0 : index
      %c0_26 = arith.constant 0 : index
      %c0_27 = arith.constant 0 : index
      %38 = vector.load %arg7[%c0_25, %c0_26, %c0_27] : memref<1x12x128xf32, #tpu.memory_space<vmem>>, vector<1x12x128xf32>
      %39 = vector.shape_cast %38 : vector<1x12x128xf32> to vector<12x128xf32>
      %cst_28 = arith.constant 0.000000e+00 : f32
      %40 = vector.broadcast %cst_28 : f32 to vector<12x128xf32>
      %41 = arith.cmpf one, %18, %40 : vector<12x128xf32>
      %cst_29 = arith.constant 1.000000e+00 : f32
      %cst_30 = arith.constant 0.000000e+00 : f32
      %42 = vector.broadcast %cst_29 : f32 to vector<12x128xf32>
      %43 = vector.broadcast %cst_30 : f32 to vector<12x128xf32>
      %44 = arith.select %41, %42, %43 : vector<12x128xi1>, vector<12x128xf32>
      %45 = arith.addf %39, %44 : vector<12x128xf32>
      %c0_31 = arith.constant 0 : index
      %c0_32 = arith.constant 0 : index
      %c0_33 = arith.constant 0 : index
      %46 = vector.load %arg7[%c0_31, %c0_32, %c0_33] : memref<1x12x128xf32, #tpu.memory_space<vmem>>, vector<1x12x128xf32>
      %47 = vector.shape_cast %46 : vector<1x12x128xf32> to vector<12x128xf32>
      %48 = vector.shape_cast %45 : vector<12x128xf32> to vector<1x12x128xf32>
      tpu.vector_store %arg7[%c0_31, %c0_32, %c0_33], %48 {strides = array<i32>} : memref<1x12x128xf32, #tpu.memory_space<vmem>>, vector<1x12x128xf32>,
    } else {
    }
    %14 = arith.extui %10 : i1 to i32
    %c0_i32_9 = arith.constant 0 : i32
    %15 = arith.cmpi ne, %14, %c0_i32_9 : i32
    scf.if %15 {
      %16 = tpu.iota {dimensions = array<i32: 0>} : vector<12x128xi32>
      %17 = vector.broadcast %8 : i32 to vector<12x128xi32>
      %18 = arith.addi %16, %17 : vector<12x128xi32>
      %c12_i32_10 = arith.constant 12 : i32
      %19 = vector.broadcast %c12_i32_10 : i32 to vector<12x128xi32>
      %20 = arith.cmpi slt, %18, %19 : vector<12x128xi32>
      %cst = arith.constant 0.000000e+00 : f32
      %21 = vector.broadcast %cst : f32 to vector<12x128xf32>
      %22 = arith.select %20, %5, %21 : vector<12x128xi1>, vector<12x128xf32>
      %23 = arith.subf %3, %4 : vector<12x128xf32>
      %24 = arith.mulf %23, %23 : vector<12x128xf32>
      %25 = arith.mulf %22, %24 : vector<12x128xf32>
      %cst_11 = arith.constant 0.000000e+00 : f32
      %26 = vector.broadcast %cst_11 : f32 to vector<12x128xf32>
      %27 = arith.cmpf ogt, %22, %26 : vector<12x128xf32>
      %c0_12 = arith.constant 0 : index
      %c0_13 = arith.constant 0 : index
      %c0_14 = arith.constant 0 : index
      %28 = vector.load %arg5[%c0_12, %c0_13, %c0_14] : memref<1x12x128xf32, #tpu.memory_space<vmem>>, vector<1x12x128xf32>
      %29 = vector.shape_cast %28 : vector<1x12x128xf32> to vector<12x128xf32>
      %cst_15 = arith.constant 0.000000e+00 : f32
      %30 = vector.broadcast %cst_15 : f32 to vector<12x128xf32>
      %31 = arith.select %27, %25, %30 : vector<12x128xi1>, vector<12x128xf32>
      %32 = arith.addf %29, %31 : vector<12x128xf32>
      %c0_16 = arith.constant 0 : index
      %c0_17 = arith.constant 0 : index
      %c0_18 = arith.constant 0 : index
      %33 = vector.load %arg5[%c0_16, %c0_17, %c0_18] : memref<1x12x128xf32, #tpu.memory_space<vmem>>, vector<1x12x128xf32>
      %34 = vector.shape_cast %33 : vector<1x12x128xf32> to vector<12x128xf32>
      %35 = vector.shape_cast %32 : vector<12x128xf32> to vector<1x12x128xf32>
      tpu.vector_store %arg5[%c0_16, %c0_17, %c0_18], %35 {strides = array<i32>} : memref<1x12x128xf32, #tpu.memory_space<vmem>>, vector<1x12x128xf32>,
      %c0_19 = arith.constant 0 : index
      %c0_20 = arith.constant 0 : index
      %c0_21 = arith.constant 0 : index
      %36 = vector.load %arg6[%c0_19, %c0_20, %c0_21] : memref<1x12x128xf32, #tpu.memory_space<vmem>>, vector<1x12x128xf32>
      %37 = vector.shape_cast %36 : vector<1x12x128xf32> to vector<12x128xf32>
      %cst_22 = arith.constant 1.000000e+00 : f32
      %cst_23 = arith.constant 0.000000e+00 : f32
      %38 = vector.broadcast %cst_22 : f32 to vector<12x128xf32>
      %39 = vector.broadcast %cst_23 : f32 to vector<12x128xf32>
      %40 = arith.select %27, %38, %39 : vector<12x128xi1>, vector<12x128xf32>
      %41 = arith.addf %37, %40 : vector<12x128xf32>
      %c0_24 = arith.constant 0 : index
      %c0_25 = arith.constant 0 : index
      %c0_26 = arith.constant 0 : index
      %42 = vector.load %arg6[%c0_24, %c0_25, %c0_26] : memref<1x12x128xf32, #tpu.memory_space<vmem>>, vector<1x12x128xf32>
      %43 = vector.shape_cast %42 : vector<1x12x128xf32> to vector<12x128xf32>
      %44 = vector.shape_cast %41 : vector<12x128xf32> to vector<1x12x128xf32>
      tpu.vector_store %arg6[%c0_24, %c0_25, %c0_26], %44 {strides = array<i32>} : memref<1x12x128xf32, #tpu.memory_space<vmem>>, vector<1x12x128xf32>,
      %c0_27 = arith.constant 0 : index
      %c0_28 = arith.constant 0 : index
      %c0_29 = arith.constant 0 : index
      %45 = vector.load %arg7[%c0_27, %c0_28, %c0_29] : memref<1x12x128xf32, #tpu.memory_space<vmem>>, vector<1x12x128xf32>
      %46 = vector.shape_cast %45 : vector<1x12x128xf32> to vector<12x128xf32>
      %cst_30 = arith.constant 0.000000e+00 : f32
      %47 = vector.broadcast %cst_30 : f32 to vector<12x128xf32>
      %48 = arith.cmpf one, %25, %47 : vector<12x128xf32>
      %49 = arith.andi %20, %48 : vector<12x128xi1>
      %cst_31 = arith.constant 1.000000e+00 : f32
      %cst_32 = arith.constant 0.000000e+00 : f32
      %50 = vector.broadcast %cst_31 : f32 to vector<12x128xf32>
      %51 = vector.broadcast %cst_32 : f32 to vector<12x128xf32>
      %52 = arith.select %49, %50, %51 : vector<12x128xi1>, vector<12x128xf32>
      %53 = arith.addf %46, %52 : vector<12x128xf32>
      %c0_33 = arith.constant 0 : index
      %c0_34 = arith.constant 0 : index
      %c0_35 = arith.constant 0 : index
      %54 = vector.load %arg7[%c0_33, %c0_34, %c0_35] : memref<1x12x128xf32, #tpu.memory_space<vmem>>, vector<1x12x128xf32>
      %55 = vector.shape_cast %54 : vector<1x12x128xf32> to vector<12x128xf32>
      %56 = vector.shape_cast %53 : vector<12x128xf32> to vector<1x12x128xf32>
      tpu.vector_store %arg7[%c0_33, %c0_34, %c0_35], %56 {strides = array<i32>} : memref<1x12x128xf32, #tpu.memory_space<vmem>>, vector<1x12x128xf32>,
    } else {
    }
    return
  }
  func.func @transform_0(%arg0: i32, %arg1: i32) -> (i32, i32) {
    %c1_i32 = arith.constant 1 : i32
    %0 = arith.muli %arg0, %c1_i32 : i32
    %1 = arith.addi %0, %arg1 : i32
    %c0_i32 = arith.constant 0 : i32
    %2 = arith.minsi %1, %c0_i32 : i32
    %c0_i32_0 = arith.constant 0 : i32
    %c0_i32_1 = arith.constant 0 : i32
    return %2, %c0_i32_0 : i32, i32
  }
  func.func @transform_1(%arg0: i32, %arg1: i32) -> (i32, i32) {
    %c1_i32 = arith.constant 1 : i32
    %0 = arith.muli %arg0, %c1_i32 : i32
    %1 = arith.addi %0, %arg1 : i32
    %c0_i32 = arith.constant 0 : i32
    %2 = arith.minsi %1, %c0_i32 : i32
    %c0_i32_0 = arith.constant 0 : i32
    %c0_i32_1 = arith.constant 0 : i32
    return %2, %c0_i32_0 : i32, i32
  }
  func.func @transform_2(%arg0: i32, %arg1: i32) -> (i32, i32) {
    %c1_i32 = arith.constant 1 : i32
    %0 = arith.muli %arg0, %c1_i32 : i32
    %1 = arith.addi %0, %arg1 : i32
    %c0_i32 = arith.constant 0 : i32
    %2 = arith.minsi %1, %c0_i32 : i32
    %c0_i32_0 = arith.constant 0 : i32
    %c0_i32_1 = arith.constant 0 : i32
    return %2, %c0_i32_0 : i32, i32
  }
  func.func @transform_3(%arg0: i32, %arg1: i32) -> (i32, i32, i32) {
    %c0_i32 = arith.constant 0 : i32
    %c0_i32_0 = arith.constant 0 : i32
    %c0_i32_1 = arith.constant 0 : i32
    return %arg0, %c0_i32, %c0_i32_0 : i32, i32, i32
  }
  func.func @transform_4(%arg0: i32, %arg1: i32) -> (i32, i32, i32) {
    %c0_i32 = arith.constant 0 : i32
    %c0_i32_0 = arith.constant 0 : i32
    %c0_i32_1 = arith.constant 0 : i32
    return %arg0, %c0_i32, %c0_i32_0 : i32, i32, i32
  }
  func.func @transform_5(%arg0: i32, %arg1: i32) -> (i32, i32, i32) {
    %c0_i32 = arith.constant 0 : i32
    %c0_i32_0 = arith.constant 0 : i32
    %c0_i32_1 = arith.constant 0 : i32
    return %arg0, %c0_i32, %c0_i32_0 : i32, i32, i32
  }
}

</mosaic_0001>

<bundles_post_ra>
// kernel: weighted_mse_loss_double.3
= control target key start
LH: loop header
LB: loop body
LE: loop exit
PB: predicated region body
PF: predicated region fallthrough
CT: control target
= control target key end

     0   :  { %s793_s18 = smov 0   ;;  %s795_s19 = smov 0   ;;  %s971_s0 = inlined_call_operand.vmem [shape: f32[40,128], index: 0, kind: input, shape index: {}]   ;;  %s972_s1 = inlined_call_operand.vmem [shape: f32[40,128], index: 1, kind: input, shape index: {}]   ;;  %s973_s2 = inlined_call_operand.vmem [shape: f32[40,128], index: 2, kind: input, shape index: {}]   ;;  %s974_s3 = inlined_call_operand.vmem [shape: f32[2,8,128], index: 3, kind: output, shape index: {0}]   ;;  %s975_s4 = inlined_call_operand.vmem [shape: f32[2,8,128], index: 4, kind: output, shape index: {1}]   ;;  %s976_s5 = inlined_call_operand.vmem [shape: f32[2,8,128], index: 5, kind: output, shape index: {2}]  }
   0x1   :  { %s797_s20 = smov 0  }
   0x2 LB: > { %s28_s21 = sadd.s32 1, %s754_s19  ;;  %p698_p0 = scmp.ge.s32.totalorder %s758_s20, 1  ;;  %s758_s20 = sphi %s797_s20, %s16_s20   ;;  %s754_s19 = sphi %s795_s19, %s978_s19   ;;  %s750_s18 = sphi %s793_s18, %s977_s18  }
   0x3   : > { %p30_p1 = scmp.ge.s32.totalorder %s28_s21, 2  ;;  %p263_p2 = scmp.lt.s32.totalorder %s758_s20, 3 }
   0x5   : > { %s980_s21 = smov (%p30_p1, %s28_s21), 0  ;;  %p264_p3 = pnand %p698_p0, %p263_p2 }
   0x6   : > { %p318_p4 = scmp.lt.s32.totalorder (!%p264_p3), %s750_s18, 0  ;;  %p353_p5 = scmp.lt.s32.totalorder (!%p264_p3), %s750_s18, 1  ;;  %v760_v0 = vmov (!%p264_p3), 0.0  }
   0x7   : > { %267 = sbr.rel (%p264_p3) target bundleno = 78 (0x4e), region = 32 }
   0x8   : > { %s388_s22 = smul.u32 (!%p264_p3), 40, %s750_s18 }
   0xa   : > { %s820_s26 = sadd.s32 (!%p264_p3), 40, %s388_s22 }
   0xb   : > { %p705_p7 = scmp.gt.s32.totalorder (!%p264_p3), %s820_s26, 40 }
   0xe   : > { %s319_s23 = scalar_select %p318_p4, %s750_s18, 0 }
   0xf   : > { %s354_s24 = scalar_select %p353_p5, %s750_s18, 1 }
  0x10   : > { %s320_s25 = smul.u32 5, %s319_s23  ;;  %v761_v30 = vmov (!%p705_p7), 0.0  }
  0x11   : > { %s702_s27 = sshll.u32 %s354_s24, 3 }
  0x12   : > { %p321_p6 = scmp.lt.s32.totalorder %s320_s25, 4  ;;  %s825_s30 = scalar_lea.vmem %s974_s3, %s702_s27 }
  0x13   : > { %369 = vst [vmem:[%s825_s30] sm:$0xff] %v760_v0  ;;  %s831_s8 = scalar_lea.vmem %s975_s4, %s702_s27  ;;  %s836_s11 = scalar_lea.vmem %s976_s5, %s702_s27 }
  0x14   : > { %s982_s25 = smov (!%p321_p6, %s320_s25), 4  ;;  %370 = vst [vmem:[%s831_s8] sm:$0xff] %v760_v0  ;;  %371 = vst [vmem:[%s836_s11] sm:$0xff] %v760_v0 }
  0x15   : > { %s699_s12 = sshll.u32 %s982_s25, 3 }
  0x16   : > { %s324_s15 = scalar_lea.vmem %s971_s0, %s699_s12  ;;  %s336_s23 = scalar_lea.vmem %s972_s1, %s699_s12 }
  0x17   : > { %s348_s29 = scalar_lea.vmem %s973_s2, %s699_s12  ;;  %v849_v1 = vld [vmem:[%s324_s15] sm:$0xff]  ;;  %v851_v2 = vld [vmem:[%s324_s15 + $0x8] sm:$0xff]  ;;  %v853_v3 = vld [vmem:[%s324_s15 + $0x10] sm:$0xff]  ;;  %394 = sbr.rel (%p705_p7) target bundleno = 47 (0x2f), region = 40 }
  0x18   : > { %v855_v4 = vld [vmem:[%s324_s15 + $0x18] sm:$0xff]  ;;  %v857_v5 = vld [vmem:[%s324_s15 + $0x20] sm:$0xff]  ;;  %v861_v7 = vld [vmem:[%s336_s23 + $0x8] sm:$0xff] }
  0x19   : > { %v859_v6 = vld [vmem:[%s336_s23] sm:$0xff]  ;;  %v863_v8 = vld [vmem:[%s336_s23 + $0x10] sm:$0xff]  ;;  %v865_v9 = vld [vmem:[%s336_s23 + $0x18] sm:$0xff]  ;;  %v396_v17 = vsub.f32 (!%p705_p7), %v851_v2, %v861_v7 }
  0x1a   : > { %v867_v10 = vld [vmem:[%s336_s23 + $0x20] sm:$0xff]  ;;  %v871_v12 = vld [vmem:[%s348_s29 + $0x8] sm:$0xff]  ;;  %v873_v13 = vld [vmem:[%s348_s29 + $0x10] sm:$0xff]  ;;  %v395_v16 = vsub.f32 (!%p705_p7), %v849_v1, %v859_v6  ;;  %v397_v18 = vsub.f32 (!%p705_p7), %v853_v3, %v863_v8  ;;  %v398_v19 = vsub.f32 (!%p705_p7), %v855_v4, %v865_v9 }
  0x1b   : > { %v869_v11 = vld [vmem:[%s348_s29] sm:$0xff]  ;;  %v875_v14 = vld [vmem:[%s348_s29 + $0x18] sm:$0xff]  ;;  %v399_v20 = vsub.f32 (!%p705_p7), %v857_v5, %v867_v10  ;;  %vm411_vm1 = vcmp.gt.f32.partialorder (!%p705_p7), %v871_v12, 0.0  ;;  %v401_v22 = vmul.f32 (!%p705_p7), %v396_v17, %v396_v17  ;;  %vm412_vm2 = vcmp.gt.f32.partialorder (!%p705_p7), %v873_v13, 0.0 }
  0x1c   : > { %v877_v15 = vld [vmem:[%s348_s29 + $0x20] sm:$0xff]  ;;  %vm410_vm0 = vcmp.gt.f32.partialorder (!%p705_p7), %v869_v11, 0.0  ;;  %v400_v21 = vmul.f32 (!%p705_p7), %v395_v16, %v395_v16  ;;  %v402_v23 = vmul.f32 (!%p705_p7), %v397_v18, %v397_v18  ;;  %v403_v24 = vmul.f32 (!%p705_p7), %v398_v19, %v398_v19 }
  0x1d   : > { %v404_v25 = vmul.f32 (!%p705_p7), %v399_v20, %v399_v20  ;;  %vm413_vm3 = vcmp.gt.f32.partialorder (!%p705_p7), %v875_v14, 0.0  ;;  %v406_v27 = vmul.f32 (!%p705_p7), %v401_v22, %v871_v12  ;;  %v428_v31 = vsel (!%p705_p7), %vm410_vm0, 1.0, %v761_v30  ;;  %v415_v51 = vld [vmem:[%s825_s30] sm:$0xff] (!%p705_p7) }
  0x1e   : > { %v405_v26 = vmul.f32 %v400_v21, %v869_v11  ;;  %v407_v28 = vmul.f32 %v402_v23, %v873_v13  ;;  %v408_v29 = vmul.f32 %v403_v24, %v875_v14  ;;  %v429_v32 = vsel %vm411_vm1, 1.0, %v761_v30  ;;  %v427_v55 = vld [vmem:[%s831_s8] sm:$0xff] }
  0x1f   : > { %v409_v33 = vmul.f32 %v404_v25, %v877_v15  ;;  %v417_v35 = vsel %vm411_vm1, %v406_v27, 0.0  ;;  %vm414_vm4 = vcmp.gt.f32.partialorder %v877_v15, 0.0  ;;  %v430_v39 = vsel %vm412_vm2, 1.0, %v761_v30  ;;  %v439_v62 = vld [vmem:[%s836_s11] sm:$0xff] }
  0x20   : > { %v416_v34 = vsel %vm410_vm0, %v405_v26, 0.0  ;;  %v418_v36 = vsel %vm412_vm2, %v407_v28, 0.0  ;;  %v419_v37 = vsel %vm413_vm3, %v408_v29, 0.0  ;;  %v433_v40 = vadd.f32 %v429_v32, %v428_v31 }
  0x21   : > { %v421_v38 = vadd.f32 %v417_v35, %v416_v34  ;;  %vm440_vm5 = vcmp.ne.f32.partialorder %v405_v26, 0.0  ;;  %vm441_vm6 = vcmp.ne.f32.partialorder %v406_v27, 0.0  ;;  %vm442_vm7 = vcmp.ne.f32.partialorder %v407_v28, 0.0 }
  0x22   : > { %v431_v42 = vsel %vm413_vm3, 1.0, %v761_v30  ;;  %vm443_vm8 = vcmp.ne.f32.partialorder %v408_v29, 0.0  ;;  %v445_v43 = vsel %vm440_vm5, 1.0, %v761_v30  ;;  %v420_v44 = vsel %vm414_vm4, %v409_v33, 0.0 }
  0x23   : > { %v422_v41 = vadd.f32 %v421_v38, %v418_v36  ;;  %v434_v45 = vadd.f32 %v433_v40, %v430_v39  ;;  %v446_v46 = vsel %vm441_vm6, 1.0, %v761_v30  ;;  %v447_v47 = vsel %vm442_vm7, 1.0, %v761_v30 }
  0x24   : > { %v432_v49 = vsel %vm414_vm4, 1.0, %v761_v30  ;;  %vm444_vm9 = vcmp.ne.f32.partialorder %v409_v33, 0.0  ;;  %v450_v50 = vadd.f32 %v446_v46, %v445_v43  ;;  %v448_v53 = vsel %vm443_vm8, 1.0, %v761_v30 }
  0x25   : > { %v423_v48 = vadd.f32 %v422_v41, %v419_v37  ;;  %v435_v52 = vadd.f32 %v434_v45, %v431_v42  ;;  %v449_v58 = vsel %vm444_vm9, 1.0, %v761_v30 }
  0x26   : > { %v451_v56 = vadd.f32 %v450_v50, %v447_v47 }
  0x27   : > { %v424_v54 = vadd.f32 %v423_v48, %v420_v44  ;;  %v436_v57 = vadd.f32 %v435_v52, %v432_v49 }
  0x28   : > { %v452_v60 = vadd.f32 %v451_v56, %v448_v53 }
  0x29   : > { %v425_v59 = vadd.f32 %v424_v54, %v415_v51  ;;  %v437_v61 = vadd.f32 %v436_v57, %v427_v55 }
  0x2a   : > { %v453_v63 = vadd.f32 %v452_v60, %v449_v58 }
  0x2b   : > { %426 = vst [vmem:[%s825_s30] sm:$0xff] %v425_v59  ;;  %438 = vst [vmem:[%s831_s8] sm:$0xff] %v437_v61 }
  0x2c   : > { %v454_v0 = vadd.f32 %v453_v63, %v439_v62 }
  0x2e   : > { %455 = vst [vmem:[%s836_s11] sm:$0xff] %v454_v0 }
  0x2f PF: > { %p706_p8 = scmp.le.s32.totalorder %s820_s26, 40 }
  0x30   : > { %v459_v16 = vlaneseq (!%p706_p8)  ;;  %v481_v17 = vsub.f32 (!%p706_p8), %v849_v1, %v859_v6  ;;  %v482_v18 = vsub.f32 (!%p706_p8), %v851_v2, %v861_v7  ;;  %v465_v20 = vstv (!%p706_p8), %s388_s22 }
  0x31   : > { %458 = sbr.rel (%p706_p8) target bundleno = 78 (0x4e), region = 44  ;;  %v483_v21 = vsub.f32 (!%p706_p8), %v853_v3, %v863_v8  ;;  %v484_v22 = vsub.f32 (!%p706_p8), %v855_v4, %v865_v9  ;;  %v485_v23 = vsub.f32 (!%p706_p8), %v857_v5, %v867_v10  ;;  %v762_v39 = vmov (!%p706_p8), 0.0  }
  0x32   : > { %v460_v19 = vshrl.u32 (!%p706_p8), %v459_v16, 7  ;;  %v486_v6 = vmul.f32 (!%p706_p8), %v481_v17, %v481_v17  ;;  %v487_v28 = vmul.f32 (!%p706_p8), %v482_v18, %v482_v18  ;;  %v501_v51 = vld [vmem:[%s825_s30] sm:$0xff] (!%p706_p8) }
  0x33   : > { %v488_v31 = vmul.f32 (!%p706_p8), %v483_v21, %v483_v21  ;;  %v489_v3 = vmul.f32 (!%p706_p8), %v484_v22, %v484_v22  ;;  %v490_v8 = vmul.f32 (!%p706_p8), %v485_v23, %v485_v23  ;;  %v513_v56 = vld [vmem:[%s831_s8] sm:$0xff] (!%p706_p8) }
  0x34   : > { %v461_v24 = vadd.s32 (!%p706_p8), 8, %v460_v19  ;;  %v462_v25 = vadd.s32 (!%p706_p8), 16, %v460_v19  ;;  %v463_v26 = vadd.s32 (!%p706_p8), 24, %v460_v19  ;;  %v464_v27 = vadd.s32 (!%p706_p8), 32, %v460_v19 }
  0x35   : > { %v466_v1 = vadd.s32 (!%p706_p8), %v465_v20, %v460_v19  ;;  %v525_v0 = vld [vmem:[%s836_s11] sm:$0xff] (!%p706_p8) }
  0x36   : > { %v467_v2 = vadd.s32 (!%p706_p8), %v465_v20, %v461_v24  ;;  %v468_v7 = vadd.s32 (!%p706_p8), %v465_v20, %v462_v25  ;;  %v469_v29 = vadd.s32 (!%p706_p8), %v465_v20, %v463_v26  ;;  %v470_v30 = vadd.s32 (!%p706_p8), %v465_v20, %v464_v27 }
  0x37   : > { %vm471_vm10 = vcmp.lt.s32.totalorder (!%p706_p8), %v466_v1, 40 }
  0x38   : > { %vm472_vm11 = vcmp.lt.s32.totalorder %v467_v2, 40  ;;  %vm473_vm12 = vcmp.lt.s32.totalorder %v468_v7, 40  ;;  %vm474_vm13 = vcmp.lt.s32.totalorder %v469_v29, 40  ;;  %vm475_vm14 = vcmp.lt.s32.totalorder %v470_v30, 40 }
  0x39   : > { %v476_v4 = vsel %vm471_vm10, %v869_v11, 0.0  ;;  %v477_v5 = vsel %vm472_vm11, %v871_v12, 0.0  ;;  %v478_v9 = vsel %vm473_vm12, %v873_v13, 0.0  ;;  %v479_v10 = vsel %vm474_vm13, %v875_v14, 0.0 }
  0x3a   : > { %v480_v32 = vsel %vm475_vm14, %v877_v15, 0.0  ;;  %v491_v33 = vmul.f32 %v486_v6, %v476_v4  ;;  %v492_v34 = vmul.f32 %v487_v28, %v477_v5  ;;  %v493_v35 = vmul.f32 %v488_v31, %v478_v9 }
  0x3b   : > { %vm496_vm15 = vcmp.gt.f32.partialorder %v476_v4, 0.0  ;;  %vm497_vm0 = vcmp.gt.f32.partialorder %v477_v5, 0.0  ;;  %v494_v36 = vmul.f32 %v489_v3, %v479_v10  ;;  %vm498_vm1 = vcmp.gt.f32.partialorder %v478_v9, 0.0 }
  0x3c   : > { %vm499_vm2 = vcmp.gt.f32.partialorder %v479_v10, 0.0  ;;  %v502_v11 = vsel %vm496_vm15, %v491_v33, 0.0  ;;  %v495_v37 = vmul.f32 %v490_v8, %v480_v32  ;;  %vm500_vm3 = vcmp.gt.f32.partialorder %v480_v32, 0.0 }
  0x3d   : > { %v503_v12 = vsel %vm497_vm0, %v492_v34, 0.0  ;;  %v504_v38 = vsel %vm498_vm1, %v493_v35, 0.0  ;;  %v514_v40 = vsel %vm496_vm15, 1.0, %v762_v39  ;;  %v515_v14 = vsel %vm497_vm0, 1.0, %v762_v39 }
  0x3e   : > { %v507_v13 = vadd.f32 %v503_v12, %v502_v11  ;;  %v516_v41 = vsel %vm498_vm1, 1.0, %v762_v39  ;;  %v505_v42 = vsel %vm499_vm2, %v494_v36, 0.0  ;;  %v517_v15 = vsel %vm499_vm2, 1.0, %v762_v39 }
  0x3f   : > { %v519_v43 = vadd.f32 %v515_v14, %v514_v40  ;;  %vm526_vm4 = vcmp.ne.f32.partialorder %v491_v33, 0.0  ;;  %vm527_vm5 = vcmp.ne.f32.partialorder %v492_v34, 0.0  ;;  %vm528_vm6 = vcmp.ne.f32.partialorder %v493_v35, 0.0 }
  0x40   : > { %v508_v44 = vadd.f32 %v507_v13, %v504_v38  ;;  %vm529_vm7 = vcmp.ne.f32.partialorder %v494_v36, 0.0  ;;  %vm531_vm8 = vmand %vm471_vm10, %vm526_vm4  ;;  %v506_v45 = vsel %vm500_vm3, %v495_v37, 0.0  ;;  %vm530_vm9 = vcmp.ne.f32.partialorder %v495_v37, 0.0 }
  0x41   : > { %v520_v46 = vadd.f32 %v519_v43, %v516_v41  ;;  %vm532_vm15 = vmand %vm472_vm11, %vm527_vm5  ;;  %v536_v47 = vsel %vm531_vm8, 1.0, %v762_v39  ;;  %v518_v49 = vsel %vm500_vm3, 1.0, %v762_v39 }
  0x42   : > { %v509_v48 = vadd.f32 %v508_v44, %v505_v42  ;;  %vm533_vm0 = vmand %vm473_vm12, %vm528_vm6  ;;  %v537_v50 = vsel %vm532_vm15, 1.0, %v762_v39 }
  0x43   : > { %v521_v52 = vadd.f32 %v520_v46, %v517_v15  ;;  %vm534_vm10 = vmand %vm474_vm13, %vm529_vm7  ;;  %v538_v53 = vsel %vm533_vm0, 1.0, %v762_v39  ;;  %v541_v54 = vadd.f32 %v537_v50, %v536_v47 }
  0x44   : > { %v510_v55 = vadd.f32 %v509_v48, %v506_v45  ;;  %vm535_vm11 = vmand %vm475_vm14, %vm530_vm9  ;;  %v539_v57 = vsel %vm534_vm10, 1.0, %v762_v39 }
  0x45   : > { %v522_v58 = vadd.f32 %v521_v52, %v518_v49  ;;  %v542_v59 = vadd.f32 %v541_v54, %v538_v53  ;;  %v540_v61 = vsel %vm535_vm11, 1.0, %v762_v39 }
  0x46   : > { %v511_v60 = vadd.f32 %v510_v55, %v501_v51 }
  0x47   : > { %v523_v62 = vadd.f32 %v522_v58, %v513_v56  ;;  %v543_v63 = vadd.f32 %v542_v59, %v539_v57 }
  0x48   : > { %512 = vst [vmem:[%s825_s30] sm:$0xff] %v511_v60 }
  0x49   : > { %524 = vst [vmem:[%s831_s8] sm:$0xff] %v523_v62  ;;  %v544_v16 = vadd.f32 %v543_v63, %v540_v61 }
  0x4b   : > { %v545_v17 = vadd.f32 %v544_v16, %v525_v0 }
  0x4d   : > { %546 = vst [vmem:[%s836_s11] sm:$0xff] %v545_v17 }
  0x4e PF: > { %s16_s20 = sadd.s32 1, %s758_s20   ;;  %s977_s18 = smov %s754_s19 }
  0x4f   : > { %p13_p9 = scmp.ge.s32.totalorder %s16_s20, 4   ;;  %s978_s19 = smov %s980_s21 }
  0x51   :  { %15 = sbr.rel (!%p13_p9) target bundleno = 2 (0x2), region = 104 }

// kernel: weighted_mse_loss_double.2
= control target key start
LH: loop header
LB: loop body
LE: loop exit
PB: predicated region body
PF: predicated region fallthrough
CT: control target
= control target key end

     0   :  { %s739_s18 = smov 0   ;;  %s741_s19 = smov 0   ;;  %s843_s0 = inlined_call_operand.vmem [shape: f32[12,128], index: 0, kind: input, shape index: {}]   ;;  %s844_s1 = inlined_call_operand.vmem [shape: f32[12,128], index: 1, kind: input, shape index: {}]   ;;  %s845_s2 = inlined_call_operand.vmem [shape: f32[12,128], index: 2, kind: input, shape index: {}]   ;;  %s846_s3 = inlined_call_operand.vmem [shape: f32[2,12,128], index: 3, kind: output, shape index: {0}]   ;;  %s847_s4 = inlined_call_operand.vmem [shape: f32[2,12,128], index: 4, kind: output, shape index: {1}]   ;;  %s848_s5 = inlined_call_operand.vmem [shape: f32[2,12,128], index: 5, kind: output, shape index: {2}]  }
   0x1   :  { %s743_s20 = smov 0  }
   0x2 LB: > { %s28_s21 = sadd.s32 1, %s700_s19  ;;  %p635_p0 = scmp.ge.s32.totalorder %s704_s20, 1  ;;  %s704_s20 = sphi %s743_s20, %s16_s20   ;;  %s700_s19 = sphi %s741_s19, %s850_s19   ;;  %s696_s18 = sphi %s739_s18, %s849_s18  }
   0x3   : > { %p30_p1 = scmp.ge.s32.totalorder %s28_s21, 2  ;;  %p263_p2 = scmp.lt.s32.totalorder %s704_s20, 3 }
   0x5   : > { %s852_s21 = smov (%p30_p1, %s28_s21), 0  ;;  %p264_p3 = pnand %p635_p0, %p263_p2 }
   0x6   : > { %p321_p4 = scmp.lt.s32.totalorder (!%p264_p3), %s696_s18, 0  ;;  %p356_p5 = scmp.lt.s32.totalorder (!%p264_p3), %s696_s18, 1  ;;  %v706_v0 = vmov (!%p264_p3), 0.0  }
   0x7   : > { %267 = sbr.rel (%p264_p3) target bundleno = 54 (0x36), region = 32 }
   0x8   : > { %s388_s22 = smul.u32 (!%p264_p3), 12, %s696_s18 }
   0xa   : > { %s766_s26 = sadd.s32 (!%p264_p3), 12, %s388_s22 }
   0xb   : > { %p648_p7 = scmp.gt.s32.totalorder (!%p264_p3), %s766_s26, 12 }
   0xe   : > { %s322_s23 = scalar_select %p321_p4, %s696_s18, 0 }
   0xf   : > { %s357_s24 = scalar_select %p356_p5, %s696_s18, 1 }
  0x10   : > { %s636_s25 = sshll.u32 %s322_s23, 1  ;;  %v707_v13 = vmov (!%p648_p7), 0.0  }
  0x11   : > { %p324_p6 = scmp.lt.s32.totalorder %s636_s25, 1  ;;  %s652_s27 = sshll.u32 %s357_s24, 4 }
  0x12   : > { %s771_s30 = scalar_lea.vmem %s846_s3, %s652_s27  ;;  %s776_s8 = scalar_lea.vmem %s847_s4, %s652_s27 }
  0x13   : > { %s854_s25 = smov (!%p324_p6, %s636_s25), 1  ;;  %375 = vst [vmem:[%s771_s30] sm:$0xff] %v706_v0  ;;  %376 = vst [vmem:[%s771_s30 + $0x8] sm:$0xf] %v706_v0  ;;  %s785_s11 = scalar_lea.vmem %s848_s5, %s652_s27 }
  0x14   : > { %377 = vst [vmem:[%s776_s8] sm:$0xff] %v706_v0  ;;  %378 = vst [vmem:[%s776_s8 + $0x8] sm:$0xf] %v706_v0  ;;  %s637_s12 = sshll.u32 %s854_s25, 3  ;;  %394 = sbr.rel (%p648_p7) target bundleno = 35 (0x23), region = 40 }
  0x15   : > { %379 = vst [vmem:[%s785_s11] sm:$0xff] %v706_v0  ;;  %380 = vst [vmem:[%s785_s11 + $0x8] sm:$0xf] %v706_v0  ;;  %s327_s15 = scalar_lea.vmem %s843_s0, %s637_s12  ;;  %s339_s23 = scalar_lea.vmem %s844_s1, %s637_s12 }
  0x16   : > { %s351_s29 = scalar_lea.vmem %s845_s2, %s637_s12  ;;  %v381_v1 = vld [vmem:[%s327_s15] sm:$0xff]  ;;  %v382_v2 = vld [vmem:[%s327_s15 + $0x8] sm:$0xf] }
  0x17   : > { %v383_v3 = vld [vmem:[%s339_s23] sm:$0xff]  ;;  %v384_v4 = vld [vmem:[%s339_s23 + $0x8] sm:$0xf] }
  0x18   : > { %v385_v5 = vld [vmem:[%s351_s29] sm:$0xff]  ;;  %v386_v6 = vld [vmem:[%s351_s29 + $0x8] sm:$0xf]  ;;  %v395_v7 = vsub.f32 (!%p648_p7), %v381_v1, %v383_v3  ;;  %v396_v8 = vsub.f32 (!%p648_p7), %v382_v2, %v384_v4 }
  0x19   : > { %vm401_vm0 = vcmp.gt.f32.partialorder (!%p648_p7), %v385_v5, 0.0  ;;  %vm402_vm1 = vcmp.gt.f32.partialorder (!%p648_p7), %v386_v6, 0.0 }
  0x1a   : > { %v397_v11 = vmul.f32 (!%p648_p7), %v395_v7, %v395_v7  ;;  %v398_v12 = vmul.f32 (!%p648_p7), %v396_v8, %v396_v8  ;;  %v413_v14 = vsel (!%p648_p7), %vm401_vm0, 1.0, %v707_v13  ;;  %v414_v15 = vsel (!%p648_p7), %vm402_vm1, 1.0, %v707_v13  ;;  %v403_v19 = vld [vmem:[%s771_s30] sm:$0xff] (!%p648_p7)  ;;  %v404_v21 = vld [vmem:[%s771_s30 + $0x8] sm:$0xf] (!%p648_p7) }
  0x1b   : > { %v411_v9 = vld [vmem:[%s776_s8] sm:$0xff]  ;;  %v412_v10 = vld [vmem:[%s776_s8 + $0x8] sm:$0xf] }
  0x1c   : > { %v415_v16 = vadd.f32 %v413_v14, %v411_v9  ;;  %v416_v17 = vadd.f32 %v414_v15, %v412_v10  ;;  %v399_v18 = vmul.f32 %v397_v11, %v385_v5  ;;  %v400_v20 = vmul.f32 %v398_v12, %v386_v6  ;;  %v419_v22 = vld [vmem:[%s785_s11] sm:$0xff]  ;;  %v420_v23 = vld [vmem:[%s785_s11 + $0x8] sm:$0xf] }
  0x1e   : > { %417 = vst [vmem:[%s776_s8] sm:$0xff] %v415_v16  ;;  %418 = vst [vmem:[%s776_s8 + $0x8] sm:$0xf] %v416_v17  ;;  %v405_v24 = vsel %vm401_vm0, %v399_v18, 0.0  ;;  %v406_v25 = vsel %vm402_vm1, %v400_v20, 0.0  ;;  %vm421_vm2 = vcmp.ne.f32.partialorder %v399_v18, 0.0  ;;  %vm422_vm3 = vcmp.ne.f32.partialorder %v400_v20, 0.0 }
  0x1f   : > { %v407_v26 = vadd.f32 %v405_v24, %v403_v19  ;;  %v408_v27 = vadd.f32 %v406_v25, %v404_v21  ;;  %v423_v28 = vsel %vm421_vm2, 1.0, %v707_v13  ;;  %v424_v29 = vsel %vm422_vm3, 1.0, %v707_v13 }
  0x20   : > { %v425_v30 = vadd.f32 %v423_v28, %v419_v22  ;;  %v426_v31 = vadd.f32 %v424_v29, %v420_v23 }
  0x21   : > { %409 = vst [vmem:[%s771_s30] sm:$0xff] %v407_v26  ;;  %410 = vst [vmem:[%s771_s30 + $0x8] sm:$0xf] %v408_v27 }
  0x22   : > { %427 = vst [vmem:[%s785_s11] sm:$0xff] %v425_v30  ;;  %428 = vst [vmem:[%s785_s11 + $0x8] sm:$0xf] %v426_v31 }
  0x23 PF: > { %p649_p8 = scmp.le.s32.totalorder %s766_s26, 12 }
  0x24   : > { %v432_v32 = vlaneseq (!%p649_p8)  ;;  %v442_v33 = vsub.f32 (!%p649_p8), %v381_v1, %v383_v3  ;;  %v435_v34 = vstv (!%p649_p8), %s388_s22  ;;  %v443_v36 = vsub.f32 (!%p649_p8), %v382_v2, %v384_v4 }
  0x25   : > { %431 = sbr.rel (%p649_p8) target bundleno = 54 (0x36), region = 44  ;;  %v458_v43 = vld [vmem:[%s776_s8] sm:$0xff] (!%p649_p8)  ;;  %v708_v47 = vmov (!%p649_p8), 0.0   ;;  %v459_v49 = vld [vmem:[%s776_s8 + $0x8] sm:$0xf] (!%p649_p8) }
  0x26   : > { %v433_v35 = vshrl.u32 (!%p649_p8), %v432_v32, 7  ;;  %v444_v38 = vmul.f32 (!%p649_p8), %v442_v33, %v442_v33  ;;  %v445_v41 = vmul.f32 (!%p649_p8), %v443_v36, %v443_v36 }
  0x28   : > { %v436_v37 = vadd.s32 (!%p649_p8), %v435_v34, %v433_v35  ;;  %v434_v39 = vadd.s32 (!%p649_p8), 8, %v433_v35  ;;  %v450_v45 = vld [vmem:[%s771_s30] sm:$0xff] (!%p649_p8)  ;;  %v451_v52 = vld [vmem:[%s771_s30 + $0x8] sm:$0xf] (!%p649_p8) }
  0x29   : > { %v466_v56 = vld [vmem:[%s785_s11] sm:$0xff] (!%p649_p8)  ;;  %v467_v59 = vld [vmem:[%s785_s11 + $0x8] sm:$0xf] (!%p649_p8) }
  0x2a   : > { %vm438_vm4 = vcmp.lt.s32.totalorder (!%p649_p8), %v436_v37, 12  ;;  %v437_v40 = vadd.s32 (!%p649_p8), %v435_v34, %v434_v39 }
  0x2b   : > { %v440_v42 = vsel (!%p649_p8), %vm438_vm4, %v385_v5, 0.0 }
  0x2c   : > { %v446_v44 = vmul.f32 %v444_v38, %v440_v42  ;;  %vm448_vm5 = vcmp.gt.f32.partialorder %v440_v42, 0.0  ;;  %vm439_vm6 = vcmp.lt.s32.totalorder %v437_v40, 12 }
  0x2d   : > { %v441_v46 = vsel %vm439_vm6, %v386_v6, 0.0  ;;  %v460_v48 = vsel %vm448_vm5, 1.0, %v708_v47 }
  0x2e   : > { %v452_v50 = vsel %vm448_vm5, %v446_v44, 0.0  ;;  %v447_v51 = vmul.f32 %v445_v41, %v441_v46  ;;  %vm449_vm7 = vcmp.gt.f32.partialorder %v441_v46, 0.0  ;;  %v462_v53 = vadd.f32 %v460_v48, %v458_v43 }
  0x2f   : > { %v454_v54 = vadd.f32 %v452_v50, %v450_v45  ;;  %v461_v55 = vsel %vm449_vm7, 1.0, %v708_v47  ;;  %vm468_vm8 = vcmp.ne.f32.partialorder %v446_v44, 0.0 }
  0x30   : > { %v453_v57 = vsel %vm449_vm7, %v447_v51, 0.0  ;;  %464 = vst [vmem:[%s776_s8] sm:$0xff] %v462_v53  ;;  %v463_v58 = vadd.f32 %v461_v55, %v459_v49  ;;  %vm470_vm9 = vmand %vm438_vm4, %vm468_vm8  ;;  %vm469_vm10 = vcmp.ne.f32.partialorder %v447_v51, 0.0 }
  0x31   : > { %456 = vst [vmem:[%s771_s30] sm:$0xff] %v454_v54  ;;  %v455_v60 = vadd.f32 %v453_v57, %v451_v52  ;;  %v472_v61 = vsel %vm470_vm9, 1.0, %v708_v47  ;;  %vm471_vm11 = vmand %vm439_vm6, %vm469_vm10 }
  0x32   : > { %465 = vst [vmem:[%s776_s8 + $0x8] sm:$0xf] %v463_v58  ;;  %v474_v62 = vadd.f32 %v472_v61, %v466_v56  ;;  %v473_v63 = vsel %vm471_vm11, 1.0, %v708_v47 }
  0x33   : > { %457 = vst [vmem:[%s771_s30 + $0x8] sm:$0xf] %v455_v60  ;;  %v475_v0 = vadd.f32 %v473_v63, %v467_v59 }
  0x34   : > { %476 = vst [vmem:[%s785_s11] sm:$0xff] %v474_v62 }
  0x35   : > { %477 = vst [vmem:[%s785_s11 + $0x8] sm:$0xf] %v475_v0 }
  0x36 PF: > { %s16_s20 = sadd.s32 1, %s704_s20   ;;  %s849_s18 = smov %s700_s19 }
  0x37   : > { %p13_p9 = scmp.ge.s32.totalorder %s16_s20, 4   ;;  %s850_s19 = smov %s852_s21 }
  0x39   :  { %15 = sbr.rel (!%p13_p9) target bundleno = 2 (0x2), region = 104 }

</bundles_post_ra>
